<compile_context>
chip_gen: v5e
topology: v5e:2x2
jax: 0.10.0
libtpu: 0.0.40
codegen_flags: <defaults>
</compile_context>

<pallas_src>
import jax
import jax.numpy as jnp
from jax import lax
from jax.experimental import pallas as pl
from jax.experimental.pallas import tpu as pltpu


# contract the last dims: (1, H) x (TB, H) -> (1, TB)   (i.e. a @ b.T)
_TRANS_B = (((1,), (1,)), ((), ()))


def _round_up(x, m):
    return (x + m - 1) // m * m


def _reward_kernel(obs_ref, act_ref, nxt_ref,
                   w_obs_ref, b_obs_ref,
                   w_act_ref, b_act_ref,
                   w_nxt_ref, b_nxt_ref,
                   w_fc_ref, b_fc_ref,
                   out_ref):
    f32, bf16 = jnp.float32, jnp.bfloat16

    def branch(x_ref, w_ref, b_ref):
        # f32 activations are cast to bf16 on the VPU right before the MXU push;
        # accumulation / bias / ReLU stay f32.
        x = x_ref[...].astype(bf16)
        h = jnp.dot(x, w_ref[...], preferred_element_type=f32)
        return jnp.maximum(h + b_ref[...], 0.0)              # (TB, H) f32

    h_obs = branch(obs_ref, w_obs_ref, b_obs_ref)
    h_act = branch(act_ref, w_act_ref, b_act_ref)
    h_nxt = branch(nxt_ref, w_nxt_ref, b_nxt_ref)

    def head(w_row, h):
        # (1, H) x (TB, H)^T -> (1, TB): lane-dense result row (batch on lanes),
        # bf16 MXU path with f32 accumulation.
        return lax.dot_general(w_row, h.astype(bf16), _TRANS_B,
                               preferred_element_type=f32)

    # Splitting the head over the three branch slices == concat([...]) @ w_fc^T.
    r = (head(w_fc_ref[0:1, :], h_obs)
         + head(w_fc_ref[1:2, :], h_act)
         + head(w_fc_ref[2:3, :], h_nxt))
    out_ref[...] = (r + b_fc_ref[0]).astype(out_ref.dtype)


def _max_tile_rows(obs_dim, act_dim, hidden_dim, budget_bytes=24 * 1024 * 1024):
    """Largest batch tile whose per-tile VMEM footprint fits the budget.

    Counts the double-buffered f32 input streams, their in-kernel bf16 copies
    and the three f32 (+bf16) branch activations.  Staying under ~24 MiB keeps
    us inside the default 32 MiB scoped-VMEM limit and well under v7x's 64 MiB
    physical VMEM even for large hidden_dim.
    """
    in_feats = 2 * obs_dim + act_dim
    per_row = (2 * 4 * in_feats             # double-buffered f32 input streams
               + 2 * in_feats               # in-kernel bf16 copies of inputs
               + 3 * hidden_dim * (4 + 2)   # f32 + bf16 branch activations
               + 16)                        # output row / misc
    return max(128, (budget_bytes // per_row) // 128 * 128)


def _choose_tile(batch, obs_dim, act_dim, hidden_dim, block_b):
    if batch <= 128:
        # One exact full block (block dims equal the array dims, so no (8,128)
        # divisibility constraint); nothing worth sharding at this size.
        return batch, 1
    cap = _max_tile_rows(obs_dim, act_dim, hidden_dim)
    # Guarantee >= 2 tiles so v7x's two TensorCores both get work.
    two_tiles = _round_up(pl.cdiv(batch, 2), 128)
    tb = min(_round_up(block_b, 256), cap, max(128, two_tiles))
    return tb, pl.cdiv(batch, tb)


def reward_network_forward(obs_t, act_t, obs_t_next, params, *, block_b=4096):
    """Forward pass of RewardNetwork. Returns (B, 1) float32 rewards."""
    (w_obs, b_obs, w_act, b_act, w_next, b_next, w_fc_row, b_fc) = params

    B, obs_dim = obs_t.shape
    act_dim = act_t.shape[1]
    H = w_obs.shape[1]

    bf16, f32 = jnp.bfloat16, jnp.float32
    # Weights are tiny and VMEM-resident (constant index_maps) -> cast once.
    # Activations are NOT pre-cast / pre-padded in the wrapper: they stream as
    # f32 and the cheap bf16 cast happens inside the kernel.
    w_obs = w_obs.astype(bf16)
    w_act = w_act.astype(bf16)
    w_next = w_next.astype(bf16)
    b_obs = b_obs.astype(f32).reshape(1, H)
    b_act = b_act.astype(f32).reshape(1, H)
    b_next = b_next.astype(f32).reshape(1, H)
    # Head weight row (1, 3H) -> (3, H): row r is the slice multiplying branch r.
    w_fc = w_fc_row.astype(bf16).reshape(3, H)
    b_fc = b_fc.astype(f32).reshape(1)

    tb, n_tiles = _choose_tile(B, obs_dim, act_dim, H, block_b)
    out_cols = n_tiles * tb        # >= B; garbage tail lanes are sliced off

    def tile_spec(d):              # batch-tiled activation streams
        return pl.BlockSpec((tb, d), lambda i: (i, 0))

    def resident(shape):           # full-array, constant index_map -> fetched once
        return pl.BlockSpec(shape, lambda i: (0, 0))

    out_row = pl.pallas_call(
        _reward_kernel,
        out_shape=jax.ShapeDtypeStruct((1, out_cols), f32),
        grid=(n_tiles,),
        in_specs=[
            tile_spec(obs_dim), tile_spec(act_dim), tile_spec(obs_dim),
            resident(w_obs.shape), resident(b_obs.shape),
            resident(w_act.shape), resident(b_act.shape),
            resident(w_next.shape), resident(b_next.shape),
            resident(w_fc.shape),
            pl.BlockSpec(memory_space=pltpu.MemorySpace.SMEM),   # b_fc scalar
        ],
        out_specs=pl.BlockSpec((1, tb), lambda i: (0, i)),
        compiler_params=pltpu.CompilerParams(
            dimension_semantics=("parallel",)),
    )(obs_t, act_t, obs_t_next,
      w_obs, b_obs, w_act, b_act, w_next, b_next, w_fc, b_fc)

    # (1, out_cols) lane-dense row -> (B, 1) column; drop padded tail lanes.
    return out_row.reshape(out_cols, 1)[:B]


def init_params(key, obs_dim, act_dim, hidden_dim):
    """PyTorch-style nn.Linear init (uniform +/- 1/sqrt(fan_in)).

    Branch weights stored as (in, out); head weight stored as a row (1, 3*hidden);
    biases as (1, out) / (1, 1).
    """
    def linear(k, fan_in, fan_out):
        kw, kb = jax.random.split(k)
        bound = 1.0 / jnp.sqrt(fan_in)
        w = jax.random.uniform(kw, (fan_in, fan_out), jnp.float32, -bound, bound)
        b = jax.random.uniform(kb, (1, fan_out), jnp.float32, -bound, bound)
        return w, b

    k1, k2, k3, k4 = jax.random.split(key, 4)
    w_obs, b_obs = linear(k1, obs_dim, hidden_dim)
    w_act, b_act = linear(k2, act_dim, hidden_dim)
    w_next, b_next = linear(k3, obs_dim, hidden_dim)
    w_fc, b_fc = linear(k4, hidden_dim * 3, 1)
    return (w_obs, b_obs, w_act, b_act, w_next, b_next,
            w_fc.T, b_fc.reshape(1, 1))


def reference_forward(obs_t, act_t, obs_t_next, params):
    """Pure-JAX reference, applying the same bf16 rounding as the kernel."""
    (w_obs, b_obs, w_act, b_act, w_next, b_next, w_fc_row, b_fc) = params
    hp = lax.Precision.HIGHEST

    def q(x):
        return x.astype(jnp.bfloat16).astype(jnp.float32)

    h1 = jax.nn.relu(jnp.dot(q(obs_t), q(w_obs), precision=hp) + b_obs)
    h2 = jax.nn.relu(jnp.dot(q(act_t), q(w_act), precision=hp) + b_act)
    h3 = jax.nn.relu(jnp.dot(q(obs_t_next), q(w_next), precision=hp) + b_next)
    combined = q(jnp.concatenate([h1, h2, h3], axis=-1))
    return jnp.dot(combined, q(w_fc_row).T, precision=hp) + b_fc


if __name__ == "__main__":
    obs_dim, act_dim, hidden_dim = 16, 8, 32

    key = jax.random.PRNGKey(0)
    kp, ko, ka, kn = jax.random.split(key, 4)
    params = init_params(kp, obs_dim, act_dim, hidden_dim)

    fwd = jax.jit(reward_network_forward)

    # batch=12 exercises the small single-block path (no padding, exact block);
    # batch=300 exercises the tiled path with a partial edge tile (no jnp.pad).
    for batch in (12, 300):
        obs_t = jax.random.normal(jax.random.fold_in(ko, batch),
                                  (batch, obs_dim), jnp.float32)
        act_t = jax.random.normal(jax.random.fold_in(ka, batch),
                                  (batch, act_dim), jnp.float32)
        obs_t_next = jax.random.normal(jax.random.fold_in(kn, batch),
                                       (batch, obs_dim), jnp.float32)

        out = fwd(obs_t, act_t, obs_t_next, params)
        jax.block_until_ready(out)

        ref = reference_forward(obs_t, act_t, obs_t_next, params)
        assert out.shape == (batch, 1), out.shape
        assert jnp.allclose(out, ref, atol=1e-3, rtol=1e-3), (
            float(jnp.max(jnp.abs(out - ref))))

    print("KERNEL_OK")
</pallas_src>

<mosaic_0001>
module attributes {stable_mosaic.version = 11 : i64} {
  func.func @_reward_kernel(%arg0: i32, %arg1: memref<12x16xf32, #tpu.memory_space<vmem>>, %arg2: memref<12x8xf32, #tpu.memory_space<vmem>>, %arg3: memref<12x16xf32, #tpu.memory_space<vmem>>, %arg4: memref<16x32xbf16, #tpu.memory_space<vmem>>, %arg5: memref<1x32xf32, #tpu.memory_space<vmem>>, %arg6: memref<8x32xbf16, #tpu.memory_space<vmem>>, %arg7: memref<1x32xf32, #tpu.memory_space<vmem>>, %arg8: memref<16x32xbf16, #tpu.memory_space<vmem>>, %arg9: memref<1x32xf32, #tpu.memory_space<vmem>>, %arg10: memref<3x32xbf16, #tpu.memory_space<vmem>>, %arg11: memref<1xf32, #tpu.memory_space<smem>>, %arg12: memref<1x12xf32, #tpu.memory_space<vmem>>) attributes {dimension_semantics = [#tpu.dimension_semantics<parallel>], iteration_bounds = array<i64: 1>, scalar_prefetch = 0 : i64, scratch_operands = 0 : i64, tpu.core_type = #tpu.core_type<tc>, window_params = [{transform_indices = @transform_0, window_bounds = array<i64: 12, 16>}, {transform_indices = @transform_1, window_bounds = array<i64: 12, 8>}, {transform_indices = @transform_2, window_bounds = array<i64: 12, 16>}, {pipeline_mode = #tpu.pipeline_mode<synchronous>, transform_indices = @transform_3, window_bounds = array<i64: 16, 32>}, {pipeline_mode = #tpu.pipeline_mode<synchronous>, transform_indices = @transform_4, window_bounds = array<i64: 1, 32>}, {pipeline_mode = #tpu.pipeline_mode<synchronous>, transform_indices = @transform_5, window_bounds = array<i64: 8, 32>}, {pipeline_mode = #tpu.pipeline_mode<synchronous>, transform_indices = @transform_6, window_bounds = array<i64: 1, 32>}, {pipeline_mode = #tpu.pipeline_mode<synchronous>, transform_indices = @transform_7, window_bounds = array<i64: 16, 32>}, {pipeline_mode = #tpu.pipeline_mode<synchronous>, transform_indices = @transform_8, window_bounds = array<i64: 1, 32>}, {pipeline_mode = #tpu.pipeline_mode<synchronous>, transform_indices = @transform_9, window_bounds = array<i64: 3, 32>}, {transform_indices = @transform_10, window_bounds = array<i64: 1>}, {transform_indices = @transform_11, window_bounds = array<i64: 1, 12>}]} {
    %c0 = arith.constant 0 : index
    %c0_0 = arith.constant 0 : index
    %0 = vector.load %arg1[%c0, %c0_0] : memref<12x16xf32, #tpu.memory_space<vmem>>, vector<12x16xf32>
    %1 = arith.truncf %0 : vector<12x16xf32> to vector<12x16xbf16>
    %c0_1 = arith.constant 0 : index
    %c0_2 = arith.constant 0 : index
    %2 = vector.load %arg4[%c0_1, %c0_2] : memref<16x32xbf16, #tpu.memory_space<vmem>>, vector<16x32xbf16>
    %cst = arith.constant dense<0.000000e+00> : vector<12x32xf32>
    %3 = tpu.matmul %1, %2, %cst {dimension_numbers = #tpu.dot_dimension_numbers<[1], [0], [0], [1], [0, 0, 1, 1], [], []>} : vector<12x16xbf16>, vector<16x32xbf16>, vector<12x32xf32> -> vector<12x32xf32>
    %c0_3 = arith.constant 0 : index
    %c0_4 = arith.constant 0 : index
    %4 = vector.load %arg5[%c0_3, %c0_4] : memref<1x32xf32, #tpu.memory_space<vmem>>, vector<1x32xf32>
    %5 = vector.broadcast %4 : vector<1x32xf32> to vector<12x32xf32>
    %6 = arith.addf %3, %5 : vector<12x32xf32>
    %cst_5 = arith.constant 0.000000e+00 : f32
    %7 = vector.broadcast %cst_5 : f32 to vector<12x32xf32>
    %8 = arith.maximumf %6, %7 : vector<12x32xf32>
    %c0_6 = arith.constant 0 : index
    %c0_7 = arith.constant 0 : index
    %9 = vector.load %arg2[%c0_6, %c0_7] : memref<12x8xf32, #tpu.memory_space<vmem>>, vector<12x8xf32>
    %10 = arith.truncf %9 : vector<12x8xf32> to vector<12x8xbf16>
    %c0_8 = arith.constant 0 : index
    %c0_9 = arith.constant 0 : index
    %11 = vector.load %arg6[%c0_8, %c0_9] : memref<8x32xbf16, #tpu.memory_space<vmem>>, vector<8x32xbf16>
    %cst_10 = arith.constant dense<0.000000e+00> : vector<12x32xf32>
    %12 = tpu.matmul %10, %11, %cst_10 {dimension_numbers = #tpu.dot_dimension_numbers<[1], [0], [0], [1], [0, 0, 1, 1], [], []>} : vector<12x8xbf16>, vector<8x32xbf16>, vector<12x32xf32> -> vector<12x32xf32>
    %c0_11 = arith.constant 0 : index
    %c0_12 = arith.constant 0 : index
    %13 = vector.load %arg7[%c0_11, %c0_12] : memref<1x32xf32, #tpu.memory_space<vmem>>, vector<1x32xf32>
    %14 = vector.broadcast %13 : vector<1x32xf32> to vector<12x32xf32>
    %15 = arith.addf %12, %14 : vector<12x32xf32>
    %cst_13 = arith.constant 0.000000e+00 : f32
    %16 = vector.broadcast %cst_13 : f32 to vector<12x32xf32>
    %17 = arith.maximumf %15, %16 : vector<12x32xf32>
    %c0_14 = arith.constant 0 : index
    %c0_15 = arith.constant 0 : index
    %18 = vector.load %arg3[%c0_14, %c0_15] : memref<12x16xf32, #tpu.memory_space<vmem>>, vector<12x16xf32>
    %19 = arith.truncf %18 : vector<12x16xf32> to vector<12x16xbf16>
    %c0_16 = arith.constant 0 : index
    %c0_17 = arith.constant 0 : index
    %20 = vector.load %arg8[%c0_16, %c0_17] : memref<16x32xbf16, #tpu.memory_space<vmem>>, vector<16x32xbf16>
    %cst_18 = arith.constant dense<0.000000e+00> : vector<12x32xf32>
    %21 = tpu.matmul %19, %20, %cst_18 {dimension_numbers = #tpu.dot_dimension_numbers<[1], [0], [0], [1], [0, 0, 1, 1], [], []>} : vector<12x16xbf16>, vector<16x32xbf16>, vector<12x32xf32> -> vector<12x32xf32>
    %c0_19 = arith.constant 0 : index
    %c0_20 = arith.constant 0 : index
    %22 = vector.load %arg9[%c0_19, %c0_20] : memref<1x32xf32, #tpu.memory_space<vmem>>, vector<1x32xf32>
    %23 = vector.broadcast %22 : vector<1x32xf32> to vector<12x32xf32>
    %24 = arith.addf %21, %23 : vector<12x32xf32>
    %cst_21 = arith.constant 0.000000e+00 : f32
    %25 = vector.broadcast %cst_21 : f32 to vector<12x32xf32>
    %26 = arith.maximumf %24, %25 : vector<12x32xf32>
    %c0_22 = arith.constant 0 : index
    %c0_23 = arith.constant 0 : index
    %27 = vector.load %arg10[%c0_22, %c0_23] : memref<3x32xbf16, #tpu.memory_space<vmem>>, vector<1x32xbf16>
    %28 = arith.truncf %8 : vector<12x32xf32> to vector<12x32xbf16>
    %cst_24 = arith.constant dense<0.000000e+00> : vector<1x12xf32>
    %29 = tpu.matmul %27, %28, %cst_24 {dimension_numbers = #tpu.dot_dimension_numbers<[1], [1], [0], [0], [0, 0, 1, 0], [], []>} : vector<1x32xbf16>, vector<12x32xbf16>, vector<1x12xf32> -> vector<1x12xf32>
    %c1 = arith.constant 1 : index
    %c0_25 = arith.constant 0 : index
    %30 = vector.load %arg10[%c1, %c0_25] : memref<3x32xbf16, #tpu.memory_space<vmem>>, vector<1x32xbf16>
    %31 = arith.truncf %17 : vector<12x32xf32> to vector<12x32xbf16>
    %cst_26 = arith.constant dense<0.000000e+00> : vector<1x12xf32>
    %32 = tpu.matmul %30, %31, %cst_26 {dimension_numbers = #tpu.dot_dimension_numbers<[1], [1], [0], [0], [0, 0, 1, 0], [], []>} : vector<1x32xbf16>, vector<12x32xbf16>, vector<1x12xf32> -> vector<1x12xf32>
    %33 = arith.addf %29, %32 : vector<1x12xf32>
    %c2 = arith.constant 2 : index
    %c0_27 = arith.constant 0 : index
    %34 = vector.load %arg10[%c2, %c0_27] : memref<3x32xbf16, #tpu.memory_space<vmem>>, vector<1x32xbf16>
    %35 = arith.truncf %26 : vector<12x32xf32> to vector<12x32xbf16>
    %cst_28 = arith.constant dense<0.000000e+00> : vector<1x12xf32>
    %36 = tpu.matmul %34, %35, %cst_28 {dimension_numbers = #tpu.dot_dimension_numbers<[1], [1], [0], [0], [0, 0, 1, 0], [], []>} : vector<1x32xbf16>, vector<12x32xbf16>, vector<1x12xf32> -> vector<1x12xf32>
    %37 = arith.addf %33, %36 : vector<1x12xf32>
    %c0_29 = arith.constant 0 : index
    %38 = memref.load %arg11[%c0_29] : memref<1xf32, #tpu.memory_space<smem>>
    %39 = vector.broadcast %38 : f32 to vector<1x12xf32>
    %40 = arith.addf %37, %39 : vector<1x12xf32>
    %c0_30 = arith.constant 0 : index
    %c0_31 = arith.constant 0 : index
    %41 = vector.load %arg12[%c0_30, %c0_31] : memref<1x12xf32, #tpu.memory_space<vmem>>, vector<1x12xf32>
    tpu.vector_store %arg12[%c0_30, %c0_31], %40 {strides = array<i32>} : memref<1x12xf32, #tpu.memory_space<vmem>>, vector<1x12xf32>,
    return
  }
  func.func @transform_0(%arg0: i32) -> (i32, i32) {
    %c0_i32 = arith.constant 0 : i32
    %c0_i32_0 = arith.constant 0 : i32
    return %arg0, %c0_i32 : i32, i32
  }
  func.func @transform_1(%arg0: i32) -> (i32, i32) {
    %c0_i32 = arith.constant 0 : i32
    %c0_i32_0 = arith.constant 0 : i32
    return %arg0, %c0_i32 : i32, i32
  }
  func.func @transform_2(%arg0: i32) -> (i32, i32) {
    %c0_i32 = arith.constant 0 : i32
    %c0_i32_0 = arith.constant 0 : i32
    return %arg0, %c0_i32 : i32, i32
  }
  func.func @transform_3(%arg0: i32) -> (i32, i32) {
    %c0_i32 = arith.constant 0 : i32
    %c0_i32_0 = arith.constant 0 : i32
    %c0_i32_1 = arith.constant 0 : i32
    return %c0_i32, %c0_i32_0 : i32, i32
  }
  func.func @transform_4(%arg0: i32) -> (i32, i32) {
    %c0_i32 = arith.constant 0 : i32
    %c0_i32_0 = arith.constant 0 : i32
    %c0_i32_1 = arith.constant 0 : i32
    return %c0_i32, %c0_i32_0 : i32, i32
  }
  func.func @transform_5(%arg0: i32) -> (i32, i32) {
    %c0_i32 = arith.constant 0 : i32
    %c0_i32_0 = arith.constant 0 : i32
    %c0_i32_1 = arith.constant 0 : i32
    return %c0_i32, %c0_i32_0 : i32, i32
  }
  func.func @transform_6(%arg0: i32) -> (i32, i32) {
    %c0_i32 = arith.constant 0 : i32
    %c0_i32_0 = arith.constant 0 : i32
    %c0_i32_1 = arith.constant 0 : i32
    return %c0_i32, %c0_i32_0 : i32, i32
  }
  func.func @transform_7(%arg0: i32) -> (i32, i32) {
    %c0_i32 = arith.constant 0 : i32
    %c0_i32_0 = arith.constant 0 : i32
    %c0_i32_1 = arith.constant 0 : i32
    return %c0_i32, %c0_i32_0 : i32, i32
  }
  func.func @transform_8(%arg0: i32) -> (i32, i32) {
    %c0_i32 = arith.constant 0 : i32
    %c0_i32_0 = arith.constant 0 : i32
    %c0_i32_1 = arith.constant 0 : i32
    return %c0_i32, %c0_i32_0 : i32, i32
  }
  func.func @transform_9(%arg0: i32) -> (i32, i32) {
    %c0_i32 = arith.constant 0 : i32
    %c0_i32_0 = arith.constant 0 : i32
    %c0_i32_1 = arith.constant 0 : i32
    return %c0_i32, %c0_i32_0 : i32, i32
  }
  func.func @transform_10(%arg0: i32) -> i32 {
    %c0_i32 = arith.constant 0 : i32
    %c0_i32_0 = arith.constant 0 : i32
    return %c0_i32 : i32
  }
  func.func @transform_11(%arg0: i32) -> (i32, i32) {
    %c0_i32 = arith.constant 0 : i32
    %c0_i32_0 = arith.constant 0 : i32
    return %c0_i32, %arg0 : i32, i32
  }
}

</mosaic_0001>

<bundles_post_ra>
// kernel: reward_network_forward.1
= control target key start
LH: loop header
LB: loop body
LE: loop exit
PB: predicated region body
PF: predicated region fallthrough
CT: control target
= control target key end

     0   :  { %vm88_vm0 = vcmask 1043456   ;;  %vm56_vm1 = vcmask 130048   ;;  %vm84_vm2 = vcmask 64512   ;;  %s397_s0 = inlined_call_operand.vmem [shape: f32[12,16], index: 0, kind: input, shape index: {}]   ;;  %s398_s1 = inlined_call_operand.vmem [shape: f32[12,8], index: 1, kind: input, shape index: {}]   ;;  %s399_s2 = inlined_call_operand.vmem [shape: f32[12,16], index: 2, kind: input, shape index: {}]   ;;  %s400_s3 = inlined_call_operand.vmem [shape: bf16[16,32], index: 3, kind: input, shape index: {}]   ;;  %s401_s4 = inlined_call_operand.vmem [shape: f32[1,32], index: 4, kind: input, shape index: {}]   ;;  %s402_s5 = inlined_call_operand.vmem [shape: bf16[8,32], index: 5, kind: input, shape index: {}]   ;;  %s403_s6 = inlined_call_operand.vmem [shape: f32[1,32], index: 6, kind: input, shape index: {}]   ;;  %s404_s7 = inlined_call_operand.vmem [shape: bf16[16,32], index: 7, kind: input, shape index: {}]   ;;  %s405_s8 = inlined_call_operand.vmem [shape: f32[1,32], index: 8, kind: input, shape index: {}]   ;;  %s406_s9 = inlined_call_operand.vmem [shape: bf16[3,32], index: 9, kind: input, shape index: {}]   ;;  %s407_s10 = inlined_call_operand.<no memory space> [shape: f32[1], index: 10, kind: input, shape index: {}]   ;;  %s408_s11 = inlined_call_operand.hbm [shape: f32[1,12], index: 11, kind: output, shape index: {}]  }
   0x1   :  { %v250_v0 = vld [vmem:[%s400_s3] sm:$0xff]  ;;  %v42_v5 = vld [vmem:[%s397_s0 + $0x8] sm:$0xf] }
   0x2   :  { %v251_v1 = vld [vmem:[%s404_s7] sm:$0xff]  ;;  %67 = vmatpush.bf16.msra.mxu0 %v250_v0  ;;  %v109_v8 = vld [vmem:[%s399_s2 + $0x8] sm:$0xf] }
   0x3   :  { %v79_v2 = vld [vmem:[%s402_s5] sm:$0xf]  ;;  %133 = vmatpush.bf16.msra.mxu2 %v251_v1  ;;  %v77_v10 = vld [vmem:[%s398_s1 + $0x8] sm:$0xf] }
   0x4   :  { %v90_v3 = vsel %vm88_vm0, %v79_v2, 0  ;;  %v41_v4 = vld [vmem:[%s397_s0] sm:$0xff] }
   0x5   :  { %v108_v6 = vld [vmem:[%s399_s2] sm:$0xff]  ;;  %v43_v7 = vpack.c.bf16 %v42_v5, %v41_v4  ;;  %99 = vmatpush.bf16.msra.mxu1 %v90_v3 }
   0x6   :  { %v76_v9 = vld [vmem:[%s398_s1] sm:$0xff]  ;;  %v110_v11 = vpack.c.bf16 %v109_v8, %v108_v6 }
   0x7   :  { %v78_v12 = vpack.c.bf16 %v77_v10, %v76_v9 }
   0x8   :  { %17 = vsyncpa [#allocation4], 0  ;;  %240 = vmatmul.msk.bf16.vlgmr.msra.gmra.mxu0 %vm56_vm1, %v43_v7  ;;  %246 = vmatmul.msk.bf16.vlgmr.msra.gmra.mxu2 %vm56_vm1, %v110_v11  ;;  %v142_v13 = vld [vmem:[%s406_s9] sm:$0x1]  ;;  %v188_v15 = vld [vmem:[%s406_s9] sm:$0x2]  ;;  %v216_v51 = vstv %s407_s10 }
   0x9   :  { %241 = vmatmul.msk.bf16.vlgmr.msra.gmra.mxu1 %vm84_vm2, %v78_v12  ;;  %146 = vst [vmem:[#allocation1] ss:$4 sm:$0xff] %v142_v13  ;;  %v253_v18 = vld [vmem:[%s401_s4] ss:$0 sm:$0xff]  ;;  %vm150_vm3 = vcmask 261120   ;;  %s227_s22 = sshll.u32 %s408_s11, 4  ;;  %s228_s22 = int_to_ptr.hbm [resolvable:$true] %s227_s22 }
   0xa   :  { %v254_v19 = vld [vmem:[%s403_s6] ss:$0 sm:$0xff]  ;;  %vm218_vm4 = vcmask 90112  }
   0xb   :  { %v255_v24 = vld [vmem:[%s405_s8] ss:$0 sm:$0xff]  ;;  %s282_s8 = smov [#allocation3]  }
   0xc   :  { %s225_s9 = sshll.u32 %s282_s8, 4  ;;  %s226_s9 = int_to_ptr.vmem [resolvable:$true] %s225_s9 }
  0x10   :  { %v147_v14 = vld.sshfl [vmem:[#allocation1] sm:$0xff pattern:$0x73625140] }
  0x11   :  { %191 = vst [vmem:[#allocation1] ss:$4 sm:$0xff] %v188_v15  ;;  %v148_v42 = vshrl.u32 %v147_v14, 16 }
  0x18   :  { %v192_v44 = vld.sshfl [vmem:[#allocation1] sm:$0xff pattern:$0x73625140] }
  0x19   :  { %v194_v45 = vrot.slane %v192_v44, 1 }
  0x85   :  { %v69_v16 = vpop.f32.mrf.mxu0 }
  0x86   :  { %v101_v17 = vpop.f32.mrf.mxu1  ;;  %v70_v21 = vadd.f32 %v253_v18, %v69_v16 }
  0x87   :  { %v102_v22 = vadd.f32 %v254_v19, %v101_v17 }
  0x88   :  { %v74_v28 = vmax.f32 %v70_v21, 0.0 }
  0x89   :  { %v106_v30 = vmax.f32 %v102_v22, 0.0 }
  0x8b   :  { %v135_v20 = vpop.f32.mrf.mxu2 }
  0x8c   :  { %v136_v32 = vadd.f32 %v255_v24, %v135_v20 }
  0x8d   :  { %v71_v23 = vpop.f32.mrf.mxu0 }
  0x8e   :  { %v72_v25 = vadd.f32 %v253_v18, %v71_v23  ;;  %v103_v26 = vpop.f32.mrf.mxu1  ;;  %v140_v39 = vmax.f32 %v136_v32, 0.0 }
  0x8f   :  { %v104_v27 = vadd.f32 %v254_v19, %v103_v26 }
  0x90   :  { %v75_v29 = vmax.f32 %v72_v25, 0.0 }
  0x91   :  { %v107_v31 = vmax.f32 %v104_v27, 0.0 }
  0x92   :  { %v143_v33 = vpack.c.bf16 %v75_v29, %v74_v28 }
  0x93   :  { %v137_v34 = vpop.f32.mrf.mxu2  ;;  %v144_v35 = vpack.c.bf16 %v107_v31, %v106_v30 }
  0x94   :  { %v138_v36 = vadd.f32 %v255_v24, %v137_v34  ;;  %v173_v37 = vsel %vm150_vm3, %v143_v33, 0 }
  0x95   :  { %182 = vmatpush.bf16.xpose.msrb.mxu0 %v173_v37  ;;  %v155_v38 = vsel %vm150_vm3, %v144_v35, 0 }
  0x96   :  { %v141_v40 = vmax.f32 %v138_v36, 0.0  ;;  %164 = vmatpush.bf16.xpose.msra.mxu3 %v155_v38 }
  0x98   :  { %v189_v41 = vpack.c.bf16 %v141_v40, %v140_v39 }
  0x9a   :  { %v199_v43 = vsel %vm150_vm3, %v189_v41, 0 }
  0x9b   :  { %208 = vmatpush.bf16.xpose.msrb.mxu1 %v199_v43 }
  0x9c   :  { %248 = vmatmul.msk.bf16.vlgmr.msrb.gmra.mxu0 %vm150_vm3, %v142_v13 }
  0x9d   :  { %247 = vmatmul.msk.bf16.vlgmr.msra.gmra.mxu3 %vm150_vm3, %v148_v42 }
  0xa2   :  { %249 = vmatmul.msk.bf16.vlgmr.msrb.gmra.mxu1 %vm150_vm3, %v194_v45 }
 0x119   :  { %v184_v46 = vpop.f32.mrf.mxu0 }
 0x11f   :  { %v210_v47 = vpop.f32.mrf.mxu1 }
 0x120   :  { %v166_v48 = vpop.f32.mrf.mxu3 }
 0x121   :  { %v185_v49 = vadd.f32 %v184_v46, %v166_v48  ;;  %v186_v50 = vpop.f32.mrf.mxu0 }
 0x123   :  { %v214_v52 = vadd.f32 %v210_v47, %v185_v49 }
 0x125   :  { %v217_v53 = vadd.f32 %v216_v51, %v214_v52 }
 0x127   :  { %v212_v54 = vpop.f32.mrf.mxu1  ;;  %219 = vst.msk [vmem:[#allocation3] sm:$0x1] %vm218_vm4, %v217_v53 }
 0x128   :  { %v168_v55 = vpop.f32.mrf.mxu3  ;;  %230 = dma.vmem_to_hbm [thread:$0]  %s226_s9, 16, %s228_s22, [#allocation4]  }
 0x129   :  { %280 = dma.done.wait [#allocation4], 16  }
 0x12a   :  { %281 = vsyncadd [#allocation4], 4294967280 }
 0x12b   :  { %235 = vsyncpa [#allocation4], 1 }

</bundles_post_ra>
